<compile_context>
chip_gen: v5e
topology: v5e:2x2
jax: 0.10.0
libtpu: 0.0.40
codegen_flags: <defaults>
</compile_context>

<pallas_src>
import math
import jax
import jax.numpy as jnp
from jax.experimental import pallas as pl
from jax.experimental.pallas import tpu as pltpu


def _round_up(x, m):
    return ((x + m - 1) // m) * m


# ---------------------------------------------------------------------------
# One-shot kernel: WD = W @ Dis.T   (computed once per forward, not per tile)
# ---------------------------------------------------------------------------
def wd_precompute_kernel(w_ref, dis_ref, wd_ref):
    # W: (Dp, Dp), Dis: (Np, Dp) -> contract last dims => (Dp, Np), no transpose.
    wd = jax.lax.dot_general(
        w_ref[...], dis_ref[...],
        dimension_numbers=(((1,), (1,)), ((), ())),
        preferred_element_type=jnp.float32)
    wd_ref[...] = wd.astype(wd_ref.dtype)


# ---------------------------------------------------------------------------
# Hot kernel: out_tile = sigmoid(Meta_tile @ WD_tile)
# ---------------------------------------------------------------------------
def decoder_kernel(meta_ref, wd_ref, out_ref):
    s = jnp.dot(meta_ref[...], wd_ref[...], preferred_element_type=jnp.float32)
    out_ref[...] = jax.nn.sigmoid(s).astype(out_ref.dtype)


def inner_product_decoder(inputs, weight, *, num_dis, dropout, key,
                          training=True, tm_max=512, tn_max=512):
    """JAX/Pallas equivalent of InnerProductDecoder.forward."""
    if training and dropout > 0.0:
        keep = 1.0 - dropout
        mask = jax.random.bernoulli(key, keep, inputs.shape)
        inputs = jnp.where(mask, inputs / keep, jnp.zeros_like(inputs))

    dis = inputs[:num_dis, :]            # (num_dis, D)
    meta = inputs[num_dis:, :]           # (M, D)
    M, D = meta.shape
    dtype = inputs.dtype

    # ---- lane-dense / MXU-aligned padding (all multiples of 128) ----
    Dp = _round_up(D, 128)
    tm = min(tm_max, _round_up(max(M, 1), 128))
    tn = min(tn_max, _round_up(max(num_dis, 1), 128))
    Mp = _round_up(max(M, 1), tm)
    Np = _round_up(max(num_dis, 1), tn)

    meta_p = jnp.pad(meta, ((0, Mp - M), (0, Dp - D)))
    dis_p = jnp.pad(dis, ((0, Np - num_dis), (0, Dp - D)))
    w_p = jnp.pad(weight, ((0, Dp - D), (0, Dp - D)))

    # ---- one-shot WD = W @ Dis.T  (Dp, Np) ----
    wd = pl.pallas_call(
        wd_precompute_kernel,
        out_shape=jax.ShapeDtypeStruct((Dp, Np), dtype),
        grid_spec=pltpu.PrefetchScalarGridSpec(
            num_scalar_prefetch=0,
            grid=(1,),
            in_specs=[
                pl.BlockSpec((Dp, Dp), lambda i: (0, 0)),
                pl.BlockSpec((Np, Dp), lambda i: (0, 0)),
            ],
            out_specs=pl.BlockSpec((Dp, Np), lambda i: (0, 0)),
        ),
        compiler_params=pltpu.CompilerParams(
            dimension_semantics=("arbitrary",),
            vmem_limit_bytes=64 * 1024 * 1024),
    )(w_p, dis_p)

    # ---- tiled main kernel: sigmoid(Meta @ WD) ----
    out_p = pl.pallas_call(
        decoder_kernel,
        out_shape=jax.ShapeDtypeStruct((Mp, Np), dtype),
        grid_spec=pltpu.PrefetchScalarGridSpec(
            num_scalar_prefetch=0,
            grid=(Mp // tm, Np // tn),
            in_specs=[
                pl.BlockSpec((tm, Dp), lambda i, j: (i, 0)),   # Meta row tile
                pl.BlockSpec((Dp, tn), lambda i, j: (0, j)),   # WD column tile
            ],
            out_specs=pl.BlockSpec((tm, tn), lambda i, j: (i, j)),
        ),
        compiler_params=pltpu.CompilerParams(
            dimension_semantics=("parallel", "parallel"),
            vmem_limit_bytes=64 * 1024 * 1024),
    )(meta_p, wd)

    return out_p[:M, :num_dis]


def xavier_uniform(key, shape, gain=1.414, dtype=jnp.float32):
    fan_in, fan_out = shape[0], shape[1]
    bound = gain * math.sqrt(6.0 / (fan_in + fan_out))
    return jax.random.uniform(key, shape, dtype=dtype, minval=-bound, maxval=bound)


if __name__ == "__main__":
    # Small, deterministic problem: 24 nodes total, 8 "disease" nodes, 32-dim features.
    output_node_dim = 32
    num_dis = 8
    num_meta = 16
    num_nodes = num_dis + num_meta
    dropout = 0.5

    key = jax.random.PRNGKey(0)
    k_in, k_w, k_drop = jax.random.split(key, 3)

    inputs = jax.random.normal(k_in, (num_nodes, output_node_dim), dtype=jnp.float32)
    weight = xavier_uniform(k_w, (output_node_dim, output_node_dim), gain=1.414)

    out = inner_product_decoder(
        inputs, weight, num_dis=num_dis, dropout=dropout, key=k_drop, training=True)
    out = jax.block_until_ready(out)

    # Pure-JAX reference (same dropout mask) for sanity.
    keep = 1.0 - dropout
    mask = jax.random.bernoulli(k_drop, keep, inputs.shape)
    x = jnp.where(mask, inputs / keep, 0.0)
    ref = jax.nn.sigmoid((x[num_dis:] @ weight) @ x[:num_dis].T)

    assert out.shape == (num_meta, num_dis)
    assert jnp.allclose(out, ref, atol=1e-5, rtol=1e-5)

    print("KERNEL_OK")
</pallas_src>

<mosaic_0001>
module attributes {stable_mosaic.version = 11 : i64} {
  func.func @wd_precompute_kernel(%arg0: i32, %arg1: memref<128x128xf32, #tpu.memory_space<vmem>>, %arg2: memref<128x128xf32, #tpu.memory_space<vmem>>, %arg3: memref<128x128xf32, #tpu.memory_space<vmem>>) attributes {dimension_semantics = [#tpu.dimension_semantics<arbitrary>], iteration_bounds = array<i64: 1>, scalar_prefetch = 0 : i64, scratch_operands = 0 : i64, tpu.core_type = #tpu.core_type<tc>, window_params = [{pipeline_mode = #tpu.pipeline_mode<synchronous>, transform_indices = @transform_0, window_bounds = array<i64: 128, 128>}, {pipeline_mode = #tpu.pipeline_mode<synchronous>, transform_indices = @transform_1, window_bounds = array<i64: 128, 128>}, {pipeline_mode = #tpu.pipeline_mode<synchronous>, transform_indices = @transform_2, window_bounds = array<i64: 128, 128>}]} {
    %c0 = arith.constant 0 : index
    %c0_0 = arith.constant 0 : index
    %0 = vector.load %arg1[%c0, %c0_0] : memref<128x128xf32, #tpu.memory_space<vmem>>, vector<128x128xf32>
    %c0_1 = arith.constant 0 : index
    %c0_2 = arith.constant 0 : index
    %1 = vector.load %arg2[%c0_1, %c0_2] : memref<128x128xf32, #tpu.memory_space<vmem>>, vector<128x128xf32>
    %cst = arith.constant dense<0.000000e+00> : vector<128x128xf32>
    %2 = tpu.matmul %0, %1, %cst {dimension_numbers = #tpu.dot_dimension_numbers<[1], [1], [0], [0], [0, 0, 1, 0], [], []>} : vector<128x128xf32>, vector<128x128xf32>, vector<128x128xf32> -> vector<128x128xf32>
    %c0_3 = arith.constant 0 : index
    %c0_4 = arith.constant 0 : index
    %3 = vector.load %arg3[%c0_3, %c0_4] : memref<128x128xf32, #tpu.memory_space<vmem>>, vector<128x128xf32>
    tpu.vector_store %arg3[%c0_3, %c0_4], %2 {strides = array<i32>} : memref<128x128xf32, #tpu.memory_space<vmem>>, vector<128x128xf32>,
    return
  }
  func.func @transform_0(%arg0: i32) -> (i32, i32) {
    %c0_i32 = arith.constant 0 : i32
    %c0_i32_0 = arith.constant 0 : i32
    %c0_i32_1 = arith.constant 0 : i32
    return %c0_i32, %c0_i32_0 : i32, i32
  }
  func.func @transform_1(%arg0: i32) -> (i32, i32) {
    %c0_i32 = arith.constant 0 : i32
    %c0_i32_0 = arith.constant 0 : i32
    %c0_i32_1 = arith.constant 0 : i32
    return %c0_i32, %c0_i32_0 : i32, i32
  }
  func.func @transform_2(%arg0: i32) -> (i32, i32) {
    %c0_i32 = arith.constant 0 : i32
    %c0_i32_0 = arith.constant 0 : i32
    %c0_i32_1 = arith.constant 0 : i32
    return %c0_i32, %c0_i32_0 : i32, i32
  }
}

</mosaic_0001>

<bundles_post_ra>
// kernel: tpu_custom_call.1
= control target key start
LH: loop header
LB: loop body
LE: loop exit
PB: predicated region body
PF: predicated region fallthrough
CT: control target
= control target key end

     0   :  { %7 = vsyncpa [#allocation3], 0  ;;  %s346_s0 = inlined_call_operand.hbm [shape: f32[128,128], index: 0, kind: input, shape index: {}]   ;;  %s347_s1 = inlined_call_operand.hbm [shape: f32[128,128], index: 1, kind: input, shape index: {}]   ;;  %s348_s2 = inlined_call_operand.hbm [shape: f32[128,128], index: 2, kind: output, shape index: {}]  }
   0x1   :  { %8 = vsyncpa [#allocation6], 0 }
   0x2   :  { %9 = vsyncpa [#allocation4], 0  ;;  %s14_s11 = sshll.u32 %s346_s0, 4  ;;  %s308_s12 = smov [#allocation2]   ;;  %s15_s11 = int_to_ptr.hbm [resolvable:$true] %s14_s11 }
   0x3   :  { %s16_s13 = sshll.u32 %s308_s12, 4  ;;  %s27_s16 = sshll.u32 %s347_s1, 4  ;;  %s17_s13 = int_to_ptr.vmem [resolvable:$true] %s16_s13  ;;  %s28_s16 = int_to_ptr.hbm [resolvable:$true] %s27_s16 }
   0x4   :  { %s309_s17 = smov 128   ;;  %s310_s18 = smov 8  }
   0x5   :  { %22 = dma.hbm_to_vmem [thread:$0]  %s15_s11, 2048, %s17_s13, [#allocation3], %s309_s17, %s309_s17, %s310_s18  }
   0x6   :  { %s311_s19 = smov [#allocation5]  }
   0x7   :  { %s29_s20 = sshll.u32 %s311_s19, 4  ;;  %s30_s20 = int_to_ptr.vmem [resolvable:$true] %s29_s20 }
   0x8   :  { %35 = dma.hbm_to_vmem [thread:$0]  %s28_s16, 2048, %s30_s20, [#allocation6], %s309_s17, %s309_s17, %s310_s18  }
   0x9   :  { %302 = dma.done.wait [#allocation3], 2048  }
   0xa   :  { %303 = vsyncadd [#allocation3], 4294965248 }
   0xb   :  { %304 = dma.done.wait [#allocation6], 2048  }
   0xc   :  { %305 = vsyncadd [#allocation6], 4294965248  ;;  %v75_v0 = vld [vmem:[#allocation5 + $0x78] sm:$0xff]  ;;  %v74_v1 = vld [vmem:[#allocation5 + $0x70] sm:$0xff]  ;;  %s312_s0 = smov [#allocation7]   ;;  %s163_s23 = sshll.u32 %s348_s2, 4  ;;  %s164_s23 = int_to_ptr.hbm [resolvable:$true] %s163_s23 }
   0xd   :  { %178 = vmatpush.xpose.msra.mxu2 %v75_v0  ;;  %179 = vmatpush.xpose.msra.mxu3 %v75_v0  ;;  %v73_v2 = vld [vmem:[#allocation5 + $0x68] sm:$0xff]  ;;  %v72_v3 = vld [vmem:[#allocation5 + $0x60] sm:$0xff]  ;;  %v71_v4 = vld [vmem:[#allocation5 + $0x58] sm:$0xff]  ;;  %s161_s1 = sshll.u32 %s312_s0, 4  ;;  %s162_s1 = int_to_ptr.vmem [resolvable:$true] %s161_s1 }
   0xe   :  { %76 = vmatpush.xpose.msra.mxu0 %v75_v0  ;;  %177 = vmatpush.xpose.msra.mxu1 %v75_v0  ;;  %v70_v5 = vld [vmem:[#allocation5 + $0x50] sm:$0xff]  ;;  %v69_v6 = vld [vmem:[#allocation5 + $0x48] sm:$0xff]  ;;  %v68_v7 = vld [vmem:[#allocation5 + $0x40] sm:$0xff] }
   0xf   :  { %v67_v8 = vld [vmem:[#allocation5 + $0x38] sm:$0xff]  ;;  %v66_v9 = vld [vmem:[#allocation5 + $0x30] sm:$0xff]  ;;  %v65_v10 = vld [vmem:[#allocation5 + $0x28] sm:$0xff] }
  0x10   :  { %v64_v11 = vld [vmem:[#allocation5 + $0x20] sm:$0xff]  ;;  %v63_v12 = vld [vmem:[#allocation5 + $0x18] sm:$0xff]  ;;  %v62_v13 = vld [vmem:[#allocation5 + $0x10] sm:$0xff] }
  0x11   :  { %181 = vmatpush.xpose.msra.mxu2 %v74_v1  ;;  %182 = vmatpush.xpose.msra.mxu3 %v74_v1  ;;  %v61_v14 = vld [vmem:[#allocation5 + $0x8] sm:$0xff]  ;;  %v60_v15 = vld [vmem:[#allocation5] sm:$0xff]  ;;  %v54_v24 = vld [vmem:[#allocation2 + $0x50] sm:$0xff] }
  0x12   :  { %77 = vmatpush.xpose.msra.mxu0 %v74_v1  ;;  %180 = vmatpush.xpose.msra.mxu1 %v74_v1  ;;  %v52_v16 = vld [vmem:[#allocation2 + $0x40] sm:$0xff]  ;;  %v53_v20 = vld [vmem:[#allocation2 + $0x48] sm:$0xff]  ;;  %v58_v25 = vld [vmem:[#allocation2 + $0x70] sm:$0xff] }
  0x13   :  { %v56_v17 = vld [vmem:[#allocation2 + $0x60] sm:$0xff]  ;;  %v57_v21 = vld [vmem:[#allocation2 + $0x68] sm:$0xff]  ;;  %v46_v26 = vld [vmem:[#allocation2 + $0x10] sm:$0xff] }
  0x14   :  { %v44_v18 = vld [vmem:[#allocation2] sm:$0xff]  ;;  %v45_v22 = vld [vmem:[#allocation2 + $0x8] sm:$0xff]  ;;  %v50_v27 = vld [vmem:[#allocation2 + $0x30] sm:$0xff] }
  0x15   :  { %184 = vmatpush.xpose.msra.mxu2 %v73_v2  ;;  %185 = vmatpush.xpose.msra.mxu3 %v73_v2  ;;  %v48_v19 = vld [vmem:[#allocation2 + $0x20] sm:$0xff]  ;;  %v49_v23 = vld [vmem:[#allocation2 + $0x28] sm:$0xff]  ;;  %v55_v28 = vld [vmem:[#allocation2 + $0x58] sm:$0xff] }
  0x16   :  { %78 = vmatpush.xpose.msra.mxu0 %v73_v2  ;;  %183 = vmatpush.xpose.msra.mxu1 %v73_v2  ;;  %v59_v29 = vld [vmem:[#allocation2 + $0x78] sm:$0xff] }
  0x17   :  { %v47_v30 = vld [vmem:[#allocation2 + $0x18] sm:$0xff] }
  0x18   :  { %v51_v31 = vld [vmem:[#allocation2 + $0x38] sm:$0xff] }
  0x19   :  { %187 = vmatpush.xpose.msra.mxu2 %v72_v3  ;;  %188 = vmatpush.xpose.msra.mxu3 %v72_v3 }
  0x1a   :  { %79 = vmatpush.xpose.msra.mxu0 %v72_v3  ;;  %186 = vmatpush.xpose.msra.mxu1 %v72_v3 }
  0x1d   :  { %190 = vmatpush.xpose.msra.mxu2 %v71_v4  ;;  %191 = vmatpush.xpose.msra.mxu3 %v71_v4 }
  0x1e   :  { %80 = vmatpush.xpose.msra.mxu0 %v71_v4  ;;  %189 = vmatpush.xpose.msra.mxu1 %v71_v4 }
  0x21   :  { %193 = vmatpush.xpose.msra.mxu2 %v70_v5  ;;  %194 = vmatpush.xpose.msra.mxu3 %v70_v5 }
  0x22   :  { %81 = vmatpush.xpose.msra.mxu0 %v70_v5  ;;  %192 = vmatpush.xpose.msra.mxu1 %v70_v5 }
  0x25   :  { %196 = vmatpush.xpose.msra.mxu2 %v69_v6  ;;  %197 = vmatpush.xpose.msra.mxu3 %v69_v6 }
  0x26   :  { %82 = vmatpush.xpose.msra.mxu0 %v69_v6  ;;  %195 = vmatpush.xpose.msra.mxu1 %v69_v6 }
  0x29   :  { %199 = vmatpush.xpose.msra.mxu2 %v68_v7  ;;  %200 = vmatpush.xpose.msra.mxu3 %v68_v7 }
  0x2a   :  { %83 = vmatpush.xpose.msra.mxu0 %v68_v7  ;;  %198 = vmatpush.xpose.msra.mxu1 %v68_v7 }
  0x2d   :  { %202 = vmatpush.xpose.msra.mxu2 %v67_v8  ;;  %203 = vmatpush.xpose.msra.mxu3 %v67_v8 }
  0x2e   :  { %84 = vmatpush.xpose.msra.mxu0 %v67_v8  ;;  %201 = vmatpush.xpose.msra.mxu1 %v67_v8 }
  0x31   :  { %205 = vmatpush.xpose.msra.mxu2 %v66_v9  ;;  %206 = vmatpush.xpose.msra.mxu3 %v66_v9 }
  0x32   :  { %85 = vmatpush.xpose.msra.mxu0 %v66_v9  ;;  %204 = vmatpush.xpose.msra.mxu1 %v66_v9 }
  0x35   :  { %208 = vmatpush.xpose.msra.mxu2 %v65_v10  ;;  %209 = vmatpush.xpose.msra.mxu3 %v65_v10 }
  0x36   :  { %86 = vmatpush.xpose.msra.mxu0 %v65_v10  ;;  %207 = vmatpush.xpose.msra.mxu1 %v65_v10 }
  0x39   :  { %211 = vmatpush.xpose.msra.mxu2 %v64_v11  ;;  %212 = vmatpush.xpose.msra.mxu3 %v64_v11 }
  0x3a   :  { %87 = vmatpush.xpose.msra.mxu0 %v64_v11  ;;  %210 = vmatpush.xpose.msra.mxu1 %v64_v11 }
  0x3d   :  { %214 = vmatpush.xpose.msra.mxu2 %v63_v12  ;;  %215 = vmatpush.xpose.msra.mxu3 %v63_v12 }
  0x3e   :  { %88 = vmatpush.xpose.msra.mxu0 %v63_v12  ;;  %213 = vmatpush.xpose.msra.mxu1 %v63_v12 }
  0x41   :  { %217 = vmatpush.xpose.msra.mxu2 %v62_v13  ;;  %218 = vmatpush.xpose.msra.mxu3 %v62_v13 }
  0x42   :  { %89 = vmatpush.xpose.msra.mxu0 %v62_v13  ;;  %216 = vmatpush.xpose.msra.mxu1 %v62_v13 }
  0x45   :  { %220 = vmatpush.xpose.msra.mxu2 %v61_v14  ;;  %221 = vmatpush.xpose.msra.mxu3 %v61_v14 }
  0x46   :  { %90 = vmatpush.xpose.msra.mxu0 %v61_v14  ;;  %219 = vmatpush.xpose.msra.mxu1 %v61_v14 }
  0x49   :  { %223 = vmatpush.xpose.msra.mxu2 %v60_v15  ;;  %224 = vmatpush.xpose.msra.mxu3 %v60_v15 }
  0x4a   :  { %91 = vmatpush.xpose.msra.mxu0 %v60_v15  ;;  %222 = vmatpush.xpose.msra.mxu1 %v60_v15 }
  0x4c   :  { %116 = vmatmul.f32.vlgmr.msra.gmra.mxu2 %v52_v16  ;;  %128 = vmatmul.f32.vlgmr.msra.gmra.mxu3 %v56_v17 }
  0x4d   :  { %92 = vmatmul.f32.vlgmr.msra.gmra.mxu0 %v44_v18  ;;  %104 = vmatmul.f32.vlgmr.msra.gmra.mxu1 %v48_v19 }
  0x54   :  { %119 = vmatmul.f32.gmra.mxu2 %v53_v20  ;;  %131 = vmatmul.f32.gmra.mxu3 %v57_v21 }
  0x55   :  { %95 = vmatmul.f32.gmra.mxu0 %v45_v22  ;;  %107 = vmatmul.f32.gmra.mxu1 %v49_v23 }
  0x5c   :  { %122 = vmatmul.f32.gmra.mxu2 %v54_v24  ;;  %134 = vmatmul.f32.gmra.mxu3 %v58_v25 }
  0x5d   :  { %98 = vmatmul.f32.gmra.mxu0 %v46_v26  ;;  %110 = vmatmul.f32.gmra.mxu1 %v50_v27 }
  0x64   :  { %125 = vmatmul.f32.gmra.mxu2 %v55_v28  ;;  %137 = vmatmul.f32.gmra.mxu3 %v59_v29 }
  0x65   :  { %101 = vmatmul.f32.gmra.mxu0 %v47_v30  ;;  %113 = vmatmul.f32.gmra.mxu1 %v51_v31 }
  0xca   :  { %v93_v32 = vpop.f32.mrf.mxu0  ;;  %v105_v33 = vpop.f32.mrf.mxu1 }
  0xcb   :  { %141 = vst [vmem:[#allocation7] sm:$0xff] %v93_v32 }
  0xcc   :  { %145 = vst [vmem:[#allocation7 + $0x20] sm:$0xff] %v105_v33 }
  0xcf   :  { %v117_v34 = vpop.f32.mrf.mxu2  ;;  %v129_v35 = vpop.f32.mrf.mxu3 }
  0xd0   :  { %149 = vst [vmem:[#allocation7 + $0x40] sm:$0xff] %v117_v34 }
  0xd1   :  { %153 = vst [vmem:[#allocation7 + $0x60] sm:$0xff] %v129_v35 }
  0xd2   :  { %v96_v36 = vpop.f32.mrf.mxu0  ;;  %v108_v37 = vpop.f32.mrf.mxu1 }
  0xd3   :  { %142 = vst [vmem:[#allocation7 + $0x8] sm:$0xff] %v96_v36 }
  0xd4   :  { %146 = vst [vmem:[#allocation7 + $0x28] sm:$0xff] %v108_v37 }
  0xd7   :  { %v120_v38 = vpop.f32.mrf.mxu2  ;;  %v132_v39 = vpop.f32.mrf.mxu3 }
  0xd8   :  { %150 = vst [vmem:[#allocation7 + $0x48] sm:$0xff] %v120_v38 }
  0xd9   :  { %154 = vst [vmem:[#allocation7 + $0x68] sm:$0xff] %v132_v39 }
  0xda   :  { %v99_v40 = vpop.f32.mrf.mxu0  ;;  %v111_v41 = vpop.f32.mrf.mxu1 }
  0xdb   :  { %143 = vst [vmem:[#allocation7 + $0x10] sm:$0xff] %v99_v40 }
  0xdc   :  { %147 = vst [vmem:[#allocation7 + $0x30] sm:$0xff] %v111_v41 }
  0xdf   :  { %v123_v42 = vpop.f32.mrf.mxu2  ;;  %v135_v43 = vpop.f32.mrf.mxu3 }
  0xe0   :  { %151 = vst [vmem:[#allocation7 + $0x50] sm:$0xff] %v123_v42 }
  0xe1   :  { %155 = vst [vmem:[#allocation7 + $0x70] sm:$0xff] %v135_v43 }
  0xe2   :  { %v102_v44 = vpop.f32.mrf.mxu0  ;;  %v114_v45 = vpop.f32.mrf.mxu1 }
  0xe3   :  { %144 = vst [vmem:[#allocation7 + $0x18] sm:$0xff] %v102_v44 }
  0xe4   :  { %148 = vst [vmem:[#allocation7 + $0x38] sm:$0xff] %v114_v45 }
  0xe7   :  { %v126_v46 = vpop.f32.mrf.mxu2  ;;  %v138_v47 = vpop.f32.mrf.mxu3 }
  0xe8   :  { %152 = vst [vmem:[#allocation7 + $0x58] sm:$0xff] %v126_v46 }
  0xe9   :  { %156 = vst [vmem:[#allocation7 + $0x78] sm:$0xff] %v138_v47 }
  0xea   :  { %169 = dma.vmem_to_hbm [thread:$0]  %s162_s1, 2048, %s164_s23, [#allocation4], %s309_s17, %s309_s17, %s310_s18  }
  0xeb   :  { %306 = dma.done.wait [#allocation4], 2048  }
  0xec   :  { %307 = vsyncadd [#allocation4], 4294965248 }
  0xed   :  { %174 = vsyncpa [#allocation3], 1 }
  0xee   :  { %175 = vsyncpa [#allocation6], 1 }
  0xef   :  { %176 = vsyncpa [#allocation4], 1 }

</bundles_post_ra>
